<compile_context>
chip_gen: v7x
topology: tpu7x:2x2x1
jax: 0.10.0
libtpu: 0.0.40
codegen_flags: <defaults>
</compile_context>

<pallas_src>
import functools

import jax
import jax.numpy as jnp
from jax.experimental import pallas as pl
from jax.experimental.pallas import tpu as pltpu  # noqa: F401  (TPU backend)

_LANE = 128      # lane width (last dim)
_SUBLANE = 8     # sublane width (second-to-last dim)


def _round_up(x, m):
    return (x + m - 1) // m * m


def _mlp_kernel(*refs, num_layers: int):
    """refs = (x_ref, w0, b0, w1, b1, ..., w_{L-1}, b_{L-1}, o_ref).

    Each w_i is pre-transposed to [K_pad, N_pad]; each b_i is [1, N_pad].
    Computes the whole MLP chain (ReLU on all but the last layer) in VMEM.
    """
    x_ref = refs[0]
    o_ref = refs[-1]
    h = x_ref[...]                                   # [B_pad, K_pad]
    for i in range(num_layers):
        w = refs[1 + 2 * i][...]                     # [K_pad, N_pad]
        b = refs[2 + 2 * i][...]                     # [1, N_pad]
        h = jnp.dot(h, w, preferred_element_type=jnp.float32) + b
        if i < num_layers - 1:
            h = jnp.maximum(h, 0.0)
    o_ref[...] = h.astype(o_ref.dtype)


def init_params(key, input_size, layer_sizes, output_size):
    """Deterministic PyTorch-style (uniform +/- 1/sqrt(fan_in)) init.

    Returned in nn.Linear layout: w is [out_features, in_features], b is [out_features].
    """
    params = []
    sizes = [input_size] + list(layer_sizes) + [output_size]
    for i in range(len(sizes) - 1):
        fan_in, fan_out = sizes[i], sizes[i + 1]
        key, kw, kb = jax.random.split(key, 3)
        bound = 1.0 / jnp.sqrt(fan_in)
        w = jax.random.uniform(kw, (fan_out, fan_in), jnp.float32, -bound, bound)
        b = jax.random.uniform(kb, (fan_out,), jnp.float32, -bound, bound)
        params.append((w, b))
    return params


def prepare_params(params):
    """One-time preprocessing: transpose weights to [K, N] and zero-pad features
    to lane multiples. Zero padding preserves the math exactly (padded activation
    lanes stay 0 through ReLU and contribute nothing downstream)."""
    prepared = []
    for w, b in params:
        n, k = w.shape                               # nn.Linear layout [N, K]
        k_pad = _round_up(k, _LANE)
        n_pad = _round_up(n, _LANE)
        wt = jnp.zeros((k_pad, n_pad), w.dtype).at[:k, :n].set(w.T)
        bp = jnp.zeros((1, n_pad), b.dtype).at[0, :n].set(b)
        prepared.append((wt, bp))
    return prepared


@functools.partial(jax.jit, static_argnames=("output_size",))
def mlp_forward(x, prepared_params, output_size):
    """Fused MLP forward.  x: [B, K] -> [B, output_size]."""
    B, K = x.shape
    num_layers = len(prepared_params)
    K_pad = prepared_params[0][0].shape[0]
    N_out_pad = prepared_params[-1][0].shape[1]
    B_pad = _round_up(B, _SUBLANE)

    # Zero-pad the activation once on the wrapper side (fused by XLA, cheap).
    x_pad = jnp.zeros((B_pad, K_pad), x.dtype).at[:B, :K].set(x)

    flat_inputs = [x_pad]
    in_specs = [pl.BlockSpec((B_pad, K_pad), lambda: (0, 0))]
    flops = 0
    bytes_accessed = x_pad.size * 4 + B_pad * N_out_pad * 4
    for wt, bp in prepared_params:
        kp, np_ = wt.shape
        flat_inputs += [wt, bp]
        in_specs += [
            pl.BlockSpec((kp, np_), lambda: (0, 0)),
            pl.BlockSpec((1, np_), lambda: (0, 0)),
        ]
        flops += 2 * B_pad * kp * np_
        bytes_accessed += (wt.size + bp.size) * 4

    kernel = functools.partial(_mlp_kernel, num_layers=num_layers)
    out_pad = pl.pallas_call(
        kernel,
        out_shape=jax.ShapeDtypeStruct((B_pad, N_out_pad), x.dtype),
        in_specs=in_specs,
        out_specs=pl.BlockSpec((B_pad, N_out_pad), lambda: (0, 0)),
        cost_estimate=pl.CostEstimate(
            flops=flops, transcendentals=0, bytes_accessed=bytes_accessed
        ),
    )(*flat_inputs)
    return out_pad[:B, :output_size]


def forward_ref(x, params):
    for w, b in params[:-1]:
        x = jnp.maximum(x @ w.T + b, 0.0)
    w, b = params[-1]
    return x @ w.T + b


# TODO(synk): for large batch / hidden sizes, switch to a tiled grid per layer
# (M/N/K tiles, fp32 VMEM accumulator, dimension_semantics=("parallel","parallel",
# "arbitrary")) instead of full-block VMEM residency.

if __name__ == "__main__":
    key = jax.random.PRNGKey(0)

    batch = 2
    input_size = 32
    layer_sizes = [64, 32]
    output_size = 16

    key, kx, kp = jax.random.split(key, 3)
    x = jax.random.normal(kx, (batch, input_size), jnp.float32)
    params = init_params(kp, input_size, layer_sizes, output_size)
    prepared = prepare_params(params)

    out = jax.block_until_ready(mlp_forward(x, prepared, output_size))
    ref = jax.block_until_ready(forward_ref(x, params))

    assert out.shape == (batch, output_size), out.shape
    assert jnp.allclose(out, ref, atol=1e-5, rtol=1e-5), "mismatch vs reference"
    print("KERNEL_OK")
</pallas_src>

<mosaic_0001>
module attributes {stable_mosaic.version = 11 : i64} {
  func.func @_mlp_kernel(%arg0: memref<8x128xf32, #tpu.memory_space<vmem>>, %arg1: memref<128x128xf32, #tpu.memory_space<vmem>>, %arg2: memref<1x128xf32, #tpu.memory_space<vmem>>, %arg3: memref<128x128xf32, #tpu.memory_space<vmem>>, %arg4: memref<1x128xf32, #tpu.memory_space<vmem>>, %arg5: memref<128x128xf32, #tpu.memory_space<vmem>>, %arg6: memref<1x128xf32, #tpu.memory_space<vmem>>, %arg7: memref<8x128xf32, #tpu.memory_space<vmem>>) attributes {dimension_semantics = [], scalar_prefetch = 0 : i64, scratch_operands = 0 : i64, tpu.core_type = #tpu.core_type<tc>} {
    %c0 = arith.constant 0 : index
    %c0_0 = arith.constant 0 : index
    %0 = vector.load %arg0[%c0, %c0_0] : memref<8x128xf32, #tpu.memory_space<vmem>>, vector<8x128xf32>
    %c0_1 = arith.constant 0 : index
    %c0_2 = arith.constant 0 : index
    %1 = vector.load %arg1[%c0_1, %c0_2] : memref<128x128xf32, #tpu.memory_space<vmem>>, vector<128x128xf32>
    %c0_3 = arith.constant 0 : index
    %c0_4 = arith.constant 0 : index
    %2 = vector.load %arg2[%c0_3, %c0_4] : memref<1x128xf32, #tpu.memory_space<vmem>>, vector<1x128xf32>
    %cst = arith.constant dense<0.000000e+00> : vector<8x128xf32>
    %3 = tpu.matmul %0, %1, %cst {dimension_numbers = #tpu.dot_dimension_numbers<[1], [0], [0], [1], [0, 0, 1, 1], [], []>} : vector<8x128xf32>, vector<128x128xf32>, vector<8x128xf32> -> vector<8x128xf32>
    %4 = vector.broadcast %2 : vector<1x128xf32> to vector<8x128xf32>
    %5 = arith.addf %3, %4 : vector<8x128xf32>
    %cst_5 = arith.constant 0.000000e+00 : f32
    %6 = vector.broadcast %cst_5 : f32 to vector<8x128xf32>
    %7 = arith.maximumf %5, %6 : vector<8x128xf32>
    %c0_6 = arith.constant 0 : index
    %c0_7 = arith.constant 0 : index
    %8 = vector.load %arg3[%c0_6, %c0_7] : memref<128x128xf32, #tpu.memory_space<vmem>>, vector<128x128xf32>
    %c0_8 = arith.constant 0 : index
    %c0_9 = arith.constant 0 : index
    %9 = vector.load %arg4[%c0_8, %c0_9] : memref<1x128xf32, #tpu.memory_space<vmem>>, vector<1x128xf32>
    %cst_10 = arith.constant dense<0.000000e+00> : vector<8x128xf32>
    %10 = tpu.matmul %7, %8, %cst_10 {dimension_numbers = #tpu.dot_dimension_numbers<[1], [0], [0], [1], [0, 0, 1, 1], [], []>} : vector<8x128xf32>, vector<128x128xf32>, vector<8x128xf32> -> vector<8x128xf32>
    %11 = vector.broadcast %9 : vector<1x128xf32> to vector<8x128xf32>
    %12 = arith.addf %10, %11 : vector<8x128xf32>
    %cst_11 = arith.constant 0.000000e+00 : f32
    %13 = vector.broadcast %cst_11 : f32 to vector<8x128xf32>
    %14 = arith.maximumf %12, %13 : vector<8x128xf32>
    %c0_12 = arith.constant 0 : index
    %c0_13 = arith.constant 0 : index
    %15 = vector.load %arg5[%c0_12, %c0_13] : memref<128x128xf32, #tpu.memory_space<vmem>>, vector<128x128xf32>
    %c0_14 = arith.constant 0 : index
    %c0_15 = arith.constant 0 : index
    %16 = vector.load %arg6[%c0_14, %c0_15] : memref<1x128xf32, #tpu.memory_space<vmem>>, vector<1x128xf32>
    %cst_16 = arith.constant dense<0.000000e+00> : vector<8x128xf32>
    %17 = tpu.matmul %14, %15, %cst_16 {dimension_numbers = #tpu.dot_dimension_numbers<[1], [0], [0], [1], [0, 0, 1, 1], [], []>} : vector<8x128xf32>, vector<128x128xf32>, vector<8x128xf32> -> vector<8x128xf32>
    %18 = vector.broadcast %16 : vector<1x128xf32> to vector<8x128xf32>
    %19 = arith.addf %17, %18 : vector<8x128xf32>
    %c0_17 = arith.constant 0 : index
    %c0_18 = arith.constant 0 : index
    %20 = vector.load %arg7[%c0_17, %c0_18] : memref<8x128xf32, #tpu.memory_space<vmem>>, vector<8x128xf32>
    tpu.vector_store %arg7[%c0_17, %c0_18], %19 {strides = array<i32>} : memref<8x128xf32, #tpu.memory_space<vmem>>, vector<8x128xf32>,
    return
  }
}

</mosaic_0001>

<bundles_post_ra>
// kernel: mlp_forward.1
= control target key start
LH: loop header
LB: loop body
LE: loop exit
PB: predicated region body
PF: predicated region fallthrough
CT: control target
= control target key end

     0   :  { %12 = vsyncpa [#allocation3], 0  ;;  %s810_s0 = inlined_call_operand.vmem [shape: f32[8,128], index: 0, kind: input, shape index: {}]   ;;  %s811_s1 = inlined_call_operand.hbm [shape: f32[128,128], index: 1, kind: input, shape index: {}]   ;;  %s812_s2 = inlined_call_operand.vmem [shape: f32[1,128], index: 2, kind: input, shape index: {}]   ;;  %s813_s3 = inlined_call_operand.hbm [shape: f32[128,128], index: 3, kind: input, shape index: {}]   ;;  %s814_s4 = inlined_call_operand.vmem [shape: f32[1,128], index: 4, kind: input, shape index: {}]   ;;  %s815_s5 = inlined_call_operand.hbm [shape: f32[128,128], index: 5, kind: input, shape index: {}]   ;;  %s816_s6 = inlined_call_operand.vmem [shape: f32[1,128], index: 6, kind: input, shape index: {}]   ;;  %s817_s7 = inlined_call_operand.vmem [shape: f32[8,128], index: 7, kind: output, shape index: {}]  }
   0x1   :  { %13 = vsyncpa [#allocation5], 0  ;;  %s665_s24 = smov [#allocation4]   ;;  %s666_s26 = smov [#allocation2]  }
   0x2   :  { %s35_s25 = sshll.u32 %s665_s24, 4  ;;  %s21_s27 = sshll.u32 %s666_s26, 4  ;;  %s36_s25 = int_to_ptr.vmem [resolvable:$true] %s35_s25  ;;  %s713_s27 = int_to_ptr.vmem [resolvable:$true] %s21_s27 }
   0x3   :  { %s595_s30 = scalar_lea.hbm %s813_s3, 2048 }
   0x4   :  { %p596_p0 = scmp.ne.s32.totalorder %s813_s3, %s595_s30  ;;  %p599_p1 = scmp.lt.u32.totalorder %s595_s30, %s813_s3 }
   0x6   :  { %p601_p2 = pnand %p599_p1, %p596_p0 }
   0x8   :  { %604 = shalt.err (!%p601_p2)
}
   0x9   :  { %s605_s12 = scalar_lea.vmem %s36_s25, 2048  ;;  %p610_p4 = scmp.lt.s32.totalorder %s36_s25, %s36_s25 }
   0xa   :  { %p606_p3 = scmp.ne.s32.totalorder %s36_s25, %s605_s12  ;;  %p611_p5 = scmp.lt.s32.totalorder %s605_s12, %s605_s12 }
   0xc   :  { %p612_p6 = por %p611_p5, %p610_p4 }
   0xe   :  { %p613_p7 = pnand %p612_p6, %p606_p3 }
  0x10   :  { %616 = shalt.err (!%p613_p7)
}
  0x11   :  { %s667_s13 = smov 128   ;;  %s668_s14 = smov 8  }
  0x12   :  { %41 = dma.hbm_to_vmem [thread:$0]  %s813_s3, 2048, %s36_s25, [#allocation5], %s667_s13, %s667_s13, %s668_s14  }
  0x13   :  { %s617_s19 = scalar_lea.hbm %s811_s1, 2048 }
  0x14   :  { %p618_p8 = scmp.ne.s32.totalorder %s811_s1, %s617_s19  ;;  %p621_p9 = scmp.lt.u32.totalorder %s617_s19, %s811_s1 }
  0x16   :  { %p623_p10 = pnand %p621_p9, %p618_p8 }
  0x18   :  { %626 = shalt.err (!%p623_p10)
}
  0x19   :  { %s627_s24 = scalar_lea.vmem %s713_s27, 2048  ;;  %p632_p12 = scmp.lt.s32.totalorder %s713_s27, %s713_s27 }
  0x1a   :  { %p628_p11 = scmp.ne.s32.totalorder %s713_s27, %s627_s24  ;;  %p633_p13 = scmp.lt.s32.totalorder %s627_s24, %s627_s24 }
  0x1c   :  { %p634_p0 = por %p633_p13, %p632_p12 }
  0x1e   :  { %p635_p1 = pnand %p634_p0, %p628_p11 }
  0x20   :  { %638 = shalt.err (!%p635_p1)
}
  0x21   :  { %27 = dma.hbm_to_vmem [thread:$0]  %s811_s1, 2048, %s713_s27, [#allocation3], %s667_s13, %s667_s13, %s668_s14  }
  0x22   :  { %s669_s26 = smov [#allocation6]   ;;  %s639_s8 = scalar_lea.hbm %s815_s5, 2048 }
  0x23   :  { %s49_s28 = sshll.u32 %s669_s26, 4  ;;  %p640_p2 = scmp.ne.s32.totalorder %s815_s5, %s639_s8  ;;  %s50_s28 = int_to_ptr.vmem [resolvable:$true] %s49_s28 }
  0x24   :  { %p643_p3 = scmp.lt.u32.totalorder %s639_s8, %s815_s5 }
  0x26   :  { %p645_p4 = pnand %p643_p3, %p640_p2 }
  0x28   :  { %648 = shalt.err (!%p645_p4)
}
  0x29   :  { %s649_s15 = scalar_lea.vmem %s50_s28, 2048  ;;  %p654_p6 = scmp.lt.s32.totalorder %s50_s28, %s50_s28 }
  0x2a   :  { %p650_p5 = scmp.ne.s32.totalorder %s50_s28, %s649_s15  ;;  %p655_p7 = scmp.lt.s32.totalorder %s649_s15, %s649_s15 }
  0x2c   :  { %p656_p8 = por %p655_p7, %p654_p6 }
  0x2e   :  { %p657_p9 = pnand %p656_p8, %p650_p5 }
  0x30   :  { %660 = shalt.err (!%p657_p9)
}
  0x31   :  { %55 = dma.hbm_to_vmem [thread:$0]  %s815_s5, 2048, %s50_s28, [#allocation5], %s667_s13, %s667_s13, %s668_s14  }
  0x32   :  { %661 = dma.done.wait [#allocation3], 2048  }
  0x33   :  { %662 = vsyncadd [#allocation3], 4294965248 }
  0x34   :  { %663 = dma.done.wait [#allocation5], 4096  }
  0x35   :  { %664 = vsyncadd [#allocation5], 4294963200  ;;  %v670_v0 = vmov 0.0|0.0   ;;  %vm671_vm0 = vmmov 0   ;;  %v672_v1 = vmov 0.0   ;;  %v68_v2 = vld [vmem:[#allocation2] sm:$0xff] }
  0x36   :  { %515 = vmatprep.subr.bf16.mxu0 %v670_v0  ;;  %442 = vmatprep.mubr.msk.f32.mxu0 %vm671_vm0, %v672_v1  ;;  %v69_v3 = vld [vmem:[#allocation2 + $0x8] sm:$0xff]  ;;  %v70_v4 = vld [vmem:[#allocation2 + $0x10] sm:$0xff]  ;;  %v71_v6 = vld [vmem:[#allocation2 + $0x18] sm:$0xff] }
  0x37   :  { %539 = vmatprep.subr.bf16.mxu1 %v670_v0  ;;  %477 = vmatprep.mubr.msk.f32.mxu1 %vm671_vm0, %v672_v1  ;;  %v516_v5 = vpack.c.bf16 %v69_v3, %v68_v2  ;;  %v519_v7 = vpack.c.bf16 %v71_v6, %v70_v4  ;;  %v72_v8 = vld [vmem:[#allocation2 + $0x20] sm:$0xff]  ;;  %v73_v9 = vld [vmem:[#allocation2 + $0x28] sm:$0xff]  ;;  %v164_v12 = vld [vmem:[#allocation4 + $0x10] sm:$0xff] }
  0x38   :  { %v162_v10 = vld [vmem:[#allocation4] sm:$0xff]  ;;  %v163_v11 = vld [vmem:[#allocation4 + $0x8] sm:$0xff]  ;;  %v165_v13 = vld [vmem:[#allocation4 + $0x18] sm:$0xff]  ;;  %v522_v14 = vpack.c.bf16 %v73_v9, %v72_v8 }
  0x39   :  { %517 = vmatpush3.bf16.msra.mxu0 %v516_v5  ;;  %v540_v15 = vpack.c.bf16 %v163_v11, %v162_v10  ;;  %v74_v16 = vld [vmem:[#allocation2 + $0x30] sm:$0xff]  ;;  %v75_v17 = vld [vmem:[#allocation2 + $0x38] sm:$0xff]  ;;  %v543_v18 = vpack.c.bf16 %v165_v13, %v164_v12  ;;  %v166_v19 = vld [vmem:[#allocation4 + $0x20] sm:$0xff] }
  0x3a   :  { %518 = vmatprep.subr.bf16.mxu0 %v670_v0  ;;  %v167_v20 = vld [vmem:[#allocation4 + $0x28] sm:$0xff]  ;;  %v525_v21 = vpack.c.bf16 %v75_v17, %v74_v16  ;;  %v76_v22 = vld [vmem:[#allocation2 + $0x40] sm:$0xff]  ;;  %v168_v25 = vld [vmem:[#allocation4 + $0x30] sm:$0xff] }
  0x3b   :  { %541 = vmatpush3.bf16.msra.mxu1 %v540_v15  ;;  %v77_v23 = vld [vmem:[#allocation2 + $0x48] sm:$0xff]  ;;  %v546_v24 = vpack.c.bf16 %v167_v20, %v166_v19  ;;  %v169_v26 = vld [vmem:[#allocation4 + $0x38] sm:$0xff]  ;;  %v78_v28 = vld [vmem:[#allocation2 + $0x50] sm:$0xff] }
  0x3c   :  { %542 = vmatprep.subr.bf16.mxu1 %v670_v0  ;;  %v528_v27 = vpack.c.bf16 %v77_v23, %v76_v22  ;;  %v79_v29 = vld [vmem:[#allocation2 + $0x58] sm:$0xff]  ;;  %v549_v30 = vpack.c.bf16 %v169_v26, %v168_v25  ;;  %v170_v31 = vld [vmem:[#allocation4 + $0x40] sm:$0xff]  ;;  %v171_v32 = vld [vmem:[#allocation4 + $0x48] sm:$0xff] }
  0x3d   :  { %520 = vmatpush3.bf16.msra.mxu0 %v519_v7  ;;  %v531_v33 = vpack.c.bf16 %v79_v29, %v78_v28  ;;  %v80_v34 = vld [vmem:[#allocation2 + $0x60] sm:$0xff]  ;;  %v81_v35 = vld [vmem:[#allocation2 + $0x68] sm:$0xff]  ;;  %v552_v36 = vpack.c.bf16 %v171_v32, %v170_v31  ;;  %v172_v37 = vld [vmem:[#allocation4 + $0x50] sm:$0xff] }
  0x3e   :  { %521 = vmatprep.subr.bf16.mxu0 %v670_v0  ;;  %v173_v38 = vld [vmem:[#allocation4 + $0x58] sm:$0xff]  ;;  %v534_v39 = vpack.c.bf16 %v81_v35, %v80_v34  ;;  %v82_v40 = vld [vmem:[#allocation2 + $0x70] sm:$0xff]  ;;  %v174_v43 = vld [vmem:[#allocation4 + $0x60] sm:$0xff] }
  0x3f   :  { %544 = vmatpush3.bf16.msra.mxu1 %v543_v18  ;;  %v83_v41 = vld [vmem:[#allocation2 + $0x78] sm:$0xff]  ;;  %v555_v42 = vpack.c.bf16 %v173_v38, %v172_v37  ;;  %v175_v44 = vld [vmem:[#allocation4 + $0x68] sm:$0xff]  ;;  %v67_v47 = vld [vmem:[%s810_s0] sm:$0xff] }
  0x40   :  { %545 = vmatprep.subr.bf16.mxu1 %v670_v0  ;;  %v537_v45 = vpack.c.bf16 %v83_v41, %v82_v40  ;;  %v558_v46 = vpack.c.bf16 %v175_v44, %v174_v43  ;;  %v176_v48 = vld [vmem:[#allocation4 + $0x70] sm:$0xff]  ;;  %v177_v49 = vld [vmem:[#allocation4 + $0x78] sm:$0xff]  ;;  %v256_v51 = vld [vmem:[#allocation6] sm:$0xff] }
  0x41   :  { %523 = vmatpush3.bf16.msra.mxu0 %v522_v14  ;;  %v561_v50 = vpack.c.bf16 %v177_v49, %v176_v48  ;;  %v257_v52 = vld [vmem:[#allocation6 + $0x8] sm:$0xff]  ;;  %v258_v53 = vld [vmem:[#allocation6 + $0x10] sm:$0xff]  ;;  %v259_v55 = vld [vmem:[#allocation6 + $0x18] sm:$0xff] }
  0x42   :  { %524 = vmatprep.subr.bf16.mxu0 %v670_v0  ;;  %v564_v54 = vpack.c.bf16 %v257_v52, %v256_v51  ;;  %v567_v56 = vpack.c.bf16 %v259_v55, %v258_v53  ;;  %v260_v57 = vld [vmem:[#allocation6 + $0x20] sm:$0xff]  ;;  %v261_v58 = vld [vmem:[#allocation6 + $0x28] sm:$0xff]  ;;  %v262_v60 = vld [vmem:[#allocation6 + $0x30] sm:$0xff] }
  0x43   :  { %547 = vmatpush3.bf16.msra.mxu1 %v546_v24  ;;  %v570_v59 = vpack.c.bf16 %v261_v58, %v260_v57  ;;  %v263_v61 = vld [vmem:[#allocation6 + $0x38] sm:$0xff]  ;;  %v264_v63 = vld [vmem:[#allocation6 + $0x40] sm:$0xff]  ;;  %v266_v3 = vld [vmem:[#allocation6 + $0x50] sm:$0xff] }
  0x44   :  { %548 = vmatprep.subr.bf16.mxu1 %v670_v0  ;;  %v573_v62 = vpack.c.bf16 %v263_v61, %v262_v60  ;;  %v267_v4 = vld [vmem:[#allocation6 + $0x58] sm:$0xff]  ;;  %v268_v6 = vld [vmem:[#allocation6 + $0x60] sm:$0xff]  ;;  %v269_v7 = vld [vmem:[#allocation6 + $0x68] sm:$0xff] }
  0x45   :  { %526 = vmatpush3.bf16.msra.mxu0 %v525_v21  ;;  %v579_v5 = vpack.c.bf16 %v267_v4, %v266_v3  ;;  %v582_v8 = vpack.c.bf16 %v269_v7, %v268_v6  ;;  %v356_v9 = vld [vmem:[%s812_s2] ss:$0 sm:$0xff]  ;;  %v270_v14 = vld [vmem:[#allocation6 + $0x70] sm:$0xff]  ;;  %v271_v15 = vld [vmem:[#allocation6 + $0x78] sm:$0xff] }
  0x46   :  { %527 = vmatprep.subr.bf16.mxu0 %v670_v0  ;;  %v585_v16 = vpack.c.bf16 %v271_v15, %v270_v14  ;;  %v357_v17 = vld [vmem:[%s814_s4] ss:$0 sm:$0xff] }
  0x47   :  { %550 = vmatpush3.bf16.msra.mxu1 %v549_v30  ;;  %v358_v21 = vld [vmem:[%s816_s6] ss:$0 sm:$0xff] }
  0x48   :  { %551 = vmatprep.subr.bf16.mxu1 %v670_v0 }
  0x49   :  { %529 = vmatpush3.bf16.msra.mxu0 %v528_v27 }
  0x4a   :  { %530 = vmatprep.subr.bf16.mxu0 %v670_v0 }
  0x4b   :  { %553 = vmatpush3.bf16.msra.mxu1 %v552_v36 }
  0x4c   :  { %554 = vmatprep.subr.bf16.mxu1 %v670_v0 }
  0x4d   :  { %532 = vmatpush3.bf16.msra.mxu0 %v531_v33 }
  0x4e   :  { %533 = vmatprep.subr.bf16.mxu0 %v670_v0 }
  0x4f   :  { %556 = vmatpush3.bf16.msra.mxu1 %v555_v42 }
  0x50   :  { %557 = vmatprep.subr.bf16.mxu1 %v670_v0 }
  0x51   :  { %535 = vmatpush3.bf16.msra.mxu0 %v534_v39 }
  0x52   :  { %536 = vmatprep.subr.bf16.mxu0 %v670_v0 }
  0x53   :  { %559 = vmatpush3.bf16.msra.mxu1 %v558_v46 }
  0x54   :  { %560 = vmatprep.subr.bf16.mxu1 %v670_v0 }
  0x55   :  { %538 = vmatpush3.bf16.msra.mxu0 %v537_v45 }
  0x56   :  { %563 = vmatprep.subr.bf16.mxu0 %v670_v0 }
  0x57   :  { %562 = vmatpush3.bf16.msra.mxu1 %v561_v50 }
  0x58   :  { %443 = vmatmul.mubr.f32.vlgmr.msra.gmra.mrb[0].mxu0 %v67_v47 }
  0x59   :  { %512 = vmatprep.mubr.msk.f32.mxu0 %vm671_vm0, %v672_v1  ;;  %565 = vmatpush3.bf16.msra.mxu0 %v564_v54  ;;  %v265_v1 = vld [vmem:[#allocation6 + $0x48] sm:$0xff] }
  0x5a   :  { %566 = vmatprep.subr.bf16.mxu0 %v670_v0  ;;  %v576_v2 = vpack.c.bf16 %v265_v1, %v264_v63 }
  0x5d   :  { %568 = vmatpush3.bf16.msra.mxu0 %v567_v56 }
  0x5e   :  { %569 = vmatprep.subr.bf16.mxu0 %v670_v0 }
  0x61   :  { %571 = vmatpush3.bf16.msra.mxu0 %v570_v59 }
  0x62   :  { %572 = vmatprep.subr.bf16.mxu0 %v670_v0 }
  0x65   :  { %574 = vmatpush3.bf16.msra.mxu0 %v573_v62 }
  0x66   :  { %575 = vmatprep.subr.bf16.mxu0 %v670_v0 }
  0x69   :  { %577 = vmatpush3.bf16.msra.mxu0 %v576_v2 }
  0x6a   :  { %578 = vmatprep.subr.bf16.mxu0 %v670_v0 }
  0x6d   :  { %580 = vmatpush3.bf16.msra.mxu0 %v579_v5 }
  0x6e   :  { %581 = vmatprep.subr.bf16.mxu0 %v670_v0 }
  0x71   :  { %583 = vmatpush3.bf16.msra.mxu0 %v582_v8 }
  0x72   :  { %584 = vmatprep.subr.bf16.mxu0 %v670_v0 }
  0x75   :  { %586 = vmatpush3.bf16.msra.mxu0 %v585_v16 }
 0x12b   :  { %v157_v10 = vpop.f32.mrb[0].mxu0 }
 0x12c   :  { %v158_v11 = vadd.f32 %v356_v9, %v157_v10  ;;  %v444_v12 = vpop.f32.mrb[1].mxu0 }
 0x12e   :  { %v161_v13 = vmax.f32 %v158_v11, 0.0 }
 0x130   :  { %478 = vmatmul.mubr.f32.vlgmr.msra.gmra.mrb[0].mxu1 %v161_v13 }
 0x203   :  { %v251_v18 = vpop.f32.mrb[0].mxu1 }
 0x204   :  { %v252_v19 = vadd.f32 %v357_v17, %v251_v18  ;;  %v479_v0 = vpop.f32.mrb[1].mxu1 }
 0x206   :  { %v255_v20 = vmax.f32 %v252_v19, 0.0 }
 0x208   :  { %513 = vmatmul.mubr.f32.vlgmr.msra.gmra.mrb[2].mxu0 %v255_v20 }
 0x2db   :  { %v345_v22 = vpop.f32.mrb[2].mxu0 }
 0x2dc   :  { %v346_v23 = vadd.f32 %v358_v21, %v345_v22  ;;  %v514_v24 = vpop.f32.mrb[3].mxu0 }
 0x2de   :  { %349 = vst [vmem:[%s817_s7] sm:$0xff] %v346_v23 }
 0x2df   :  { %354 = vsyncpa [#allocation3], 1 }
 0x2e0   :  { %355 = vsyncpa [#allocation5], 1 }

</bundles_post_ra>
